<compile_context>
chip_gen: v7x
topology: tpu7x:2x2x1
jax: 0.10.0
libtpu: 0.0.40
codegen_flags: <defaults>
</compile_context>

<pallas_src>
import jax
import jax.numpy as jnp
from jax.experimental import pallas as pl
from jax.experimental.pallas import tpu as pltpu

NUM_LINEARS = 6   # A.l1, B.a.l1, B.l1, C.l1, D.b.a.l1, D.b.l1
FEAT = 2


def _round_up(n, m):
    return ((n + m - 1) // m) * m


def e_forward_kernel(p_ref, x_ref, o_ref):
    """One lane-dense batch tile.

    p_ref : SMEM f32[12] = [Wa00, Wa01, Wa10, Wa11, ba0, ba1,
                            Wb00, Wb01, Wb10, Wb11, bb0, bb1]
            where Wa/ba fold linears 0..3 (pre-ReLU) and Wb/bb fold linears 4..5.
    x_ref : VMEM (2, TB)  feature-major input tile  (batch on the lane axis)
    o_ref : VMEM (2, TB)  feature-major output tile
    """
    r0 = x_ref[0:1, :].astype(jnp.float32)          # (1, TB)
    r1 = x_ref[1:2, :].astype(jnp.float32)          # (1, TB)

    # affine A (A.l1, B.a.l1, B.l1, C.l1 composed) + ReLU  -- pure VPU FMAs
    z0 = jnp.maximum(p_ref[0] * r0 + p_ref[2] * r1 + p_ref[4], 0.0)
    z1 = jnp.maximum(p_ref[1] * r0 + p_ref[3] * r1 + p_ref[5], 0.0)

    # affine B (D.b.a.l1, D.b.l1 composed) + sigmoid (EUP)
    y0 = jax.nn.sigmoid(p_ref[6] * z0 + p_ref[8] * z1 + p_ref[10])
    y1 = jax.nn.sigmoid(p_ref[7] * z0 + p_ref[9] * z1 + p_ref[11])

    # single lane-dense store of the whole (2, TB) block
    o_ref[...] = jnp.concatenate([y0, y1], axis=0).astype(o_ref.dtype)


def e_forward(x, weights, biases, *, block_lanes=8192):
    """x: (batch, 2); weights: (6, 2, 2) PyTorch (out, in) layout; biases: (6, 2)."""
    assert block_lanes % 128 == 0
    batch = x.shape[0]

    # --- fold the 6 affines into 2 (cheap 2x2 matmuls, done once in the wrapper) ---
    t = [jnp.asarray(weights[i], jnp.float32).T for i in range(NUM_LINEARS)]
    b = [jnp.asarray(biases[i], jnp.float32) for i in range(NUM_LINEARS)]
    wa = t[0] @ t[1] @ t[2] @ t[3]
    ba = ((b[0] @ t[1] + b[1]) @ t[2] + b[2]) @ t[3] + b[3]
    wb = t[4] @ t[5]
    bb = b[4] @ t[5] + b[5]
    params = jnp.concatenate(
        [wa.reshape(-1), ba.reshape(-1), wb.reshape(-1), bb.reshape(-1)]
    ).astype(jnp.float32)                                   # f32[12] -> SMEM

    # --- feature-major, lane-dense layout: batch -> 128-lane axis ---
    tb = min(block_lanes, _round_up(batch, 128))
    padded = _round_up(batch, tb)
    x_fm = jnp.pad(x.T, ((0, 0), (0, padded - batch)))      # (2, padded)

    out_fm = pl.pallas_call(
        e_forward_kernel,
        out_shape=jax.ShapeDtypeStruct((FEAT, padded), x.dtype),
        grid=(padded // tb,),
        in_specs=[
            pl.BlockSpec(memory_space=pltpu.MemorySpace.SMEM),   # params (whole array)
            pl.BlockSpec((FEAT, tb), lambda i: (0, i)),          # x tile
        ],
        out_specs=pl.BlockSpec((FEAT, tb), lambda i: (0, i)),
        compiler_params=pltpu.CompilerParams(
            dimension_semantics=("parallel",)),
    )(params, x_fm)

    return out_fm[:, :batch].T                               # back to (batch, 2)


def init_params(key):
    """Deterministic init mimicking nn.Linear default (uniform +-1/sqrt(fan_in))."""
    bound = 1.0 / jnp.sqrt(float(FEAT))
    kw, kb = jax.random.split(key)
    weights = jax.random.uniform(
        kw, (NUM_LINEARS, FEAT, FEAT), jnp.float32, minval=-bound, maxval=bound)
    biases = jax.random.uniform(
        kb, (NUM_LINEARS, FEAT), jnp.float32, minval=-bound, maxval=bound)
    return weights, biases


def e_forward_ref(x, weights, biases):
    """Pure-JAX reference (unfused 6-linear chain), matches PyTorch forward."""
    y = x
    acts = [None, None, None, "relu", None, "sigmoid"]
    for i in range(NUM_LINEARS):
        y = y @ weights[i].T + biases[i]
        if acts[i] == "relu":
            y = jnp.maximum(y, 0.0)
        elif acts[i] == "sigmoid":
            y = jax.nn.sigmoid(y)
    return y


if __name__ == "__main__":
    key = jax.random.PRNGKey(0)
    k_x, k_p = jax.random.split(key)
    weights, biases = init_params(k_p)

    # Small primary case (matches the module's (batch, 2) input).
    batch = 8
    x = jax.random.normal(k_x, (batch, FEAT), dtype=jnp.float32)
    out = jax.block_until_ready(e_forward(x, weights, biases))
    ref = e_forward_ref(x, weights, biases)
    assert out.shape == (batch, FEAT)
    assert jnp.max(jnp.abs(out - ref)) < 5e-5

    # Exercise the pipelined multi-block grid + ragged-batch padding path.
    batch2 = 1000
    x2 = jax.random.normal(jax.random.PRNGKey(1), (batch2, FEAT), dtype=jnp.float32)
    out2 = jax.block_until_ready(e_forward(x2, weights, biases, block_lanes=256))
    ref2 = e_forward_ref(x2, weights, biases)
    assert out2.shape == (batch2, FEAT)
    assert jnp.max(jnp.abs(out2 - ref2)) < 5e-5

    print("KERNEL_OK")
</pallas_src>

<mosaic_0001>
module attributes {stable_mosaic.version = 11 : i64} {
  func.func @e_forward_kernel(%arg0: i32, %arg1: memref<12xf32, #tpu.memory_space<smem>>, %arg2: memref<2x128xf32, #tpu.memory_space<vmem>>, %arg3: memref<2x128xf32, #tpu.memory_space<vmem>>) attributes {dimension_semantics = [#tpu.dimension_semantics<parallel>], iteration_bounds = array<i64: 1>, scalar_prefetch = 0 : i64, scratch_operands = 0 : i64, tpu.core_type = #tpu.core_type<tc>, window_params = [{transform_indices = @transform_0, window_bounds = array<i64: 12>}, {transform_indices = @transform_1, window_bounds = array<i64: 2, 128>}, {transform_indices = @transform_2, window_bounds = array<i64: 2, 128>}]} {
    %c0 = arith.constant 0 : index
    %c0_0 = arith.constant 0 : index
    %0 = vector.load %arg2[%c0, %c0_0] : memref<2x128xf32, #tpu.memory_space<vmem>>, vector<1x128xf32>
    %c1 = arith.constant 1 : index
    %c0_1 = arith.constant 0 : index
    %1 = vector.load %arg2[%c1, %c0_1] : memref<2x128xf32, #tpu.memory_space<vmem>>, vector<1x128xf32>
    %c0_2 = arith.constant 0 : index
    %2 = memref.load %arg1[%c0_2] : memref<12xf32, #tpu.memory_space<smem>>
    %3 = vector.broadcast %2 : f32 to vector<1x128xf32>
    %4 = arith.mulf %3, %0 : vector<1x128xf32>
    %c2 = arith.constant 2 : index
    %5 = memref.load %arg1[%c2] : memref<12xf32, #tpu.memory_space<smem>>
    %6 = vector.broadcast %5 : f32 to vector<1x128xf32>
    %7 = arith.mulf %6, %1 : vector<1x128xf32>
    %8 = arith.addf %4, %7 : vector<1x128xf32>
    %c4 = arith.constant 4 : index
    %9 = memref.load %arg1[%c4] : memref<12xf32, #tpu.memory_space<smem>>
    %10 = vector.broadcast %9 : f32 to vector<1x128xf32>
    %11 = arith.addf %8, %10 : vector<1x128xf32>
    %cst = arith.constant 0.000000e+00 : f32
    %12 = vector.broadcast %cst : f32 to vector<1x128xf32>
    %13 = arith.maximumf %11, %12 : vector<1x128xf32>
    %c1_3 = arith.constant 1 : index
    %14 = memref.load %arg1[%c1_3] : memref<12xf32, #tpu.memory_space<smem>>
    %15 = vector.broadcast %14 : f32 to vector<1x128xf32>
    %16 = arith.mulf %15, %0 : vector<1x128xf32>
    %c3 = arith.constant 3 : index
    %17 = memref.load %arg1[%c3] : memref<12xf32, #tpu.memory_space<smem>>
    %18 = vector.broadcast %17 : f32 to vector<1x128xf32>
    %19 = arith.mulf %18, %1 : vector<1x128xf32>
    %20 = arith.addf %16, %19 : vector<1x128xf32>
    %c5 = arith.constant 5 : index
    %21 = memref.load %arg1[%c5] : memref<12xf32, #tpu.memory_space<smem>>
    %22 = vector.broadcast %21 : f32 to vector<1x128xf32>
    %23 = arith.addf %20, %22 : vector<1x128xf32>
    %cst_4 = arith.constant 0.000000e+00 : f32
    %24 = vector.broadcast %cst_4 : f32 to vector<1x128xf32>
    %25 = arith.maximumf %23, %24 : vector<1x128xf32>
    %c6 = arith.constant 6 : index
    %26 = memref.load %arg1[%c6] : memref<12xf32, #tpu.memory_space<smem>>
    %27 = vector.broadcast %26 : f32 to vector<1x128xf32>
    %28 = arith.mulf %27, %13 : vector<1x128xf32>
    %c8 = arith.constant 8 : index
    %29 = memref.load %arg1[%c8] : memref<12xf32, #tpu.memory_space<smem>>
    %30 = vector.broadcast %29 : f32 to vector<1x128xf32>
    %31 = arith.mulf %30, %25 : vector<1x128xf32>
    %32 = arith.addf %28, %31 : vector<1x128xf32>
    %c10 = arith.constant 10 : index
    %33 = memref.load %arg1[%c10] : memref<12xf32, #tpu.memory_space<smem>>
    %34 = vector.broadcast %33 : f32 to vector<1x128xf32>
    %35 = arith.addf %32, %34 : vector<1x128xf32>
    %36 = arith.negf %35 : vector<1x128xf32>
    %37 = math.exp %36 : vector<1x128xf32>
    %cst_5 = arith.constant 1.000000e+00 : f32
    %38 = vector.broadcast %cst_5 : f32 to vector<1x128xf32>
    %39 = arith.addf %38, %37 : vector<1x128xf32>
    %40 = arith.divf %38, %39 : vector<1x128xf32>
    %c7 = arith.constant 7 : index
    %41 = memref.load %arg1[%c7] : memref<12xf32, #tpu.memory_space<smem>>
    %42 = vector.broadcast %41 : f32 to vector<1x128xf32>
    %43 = arith.mulf %42, %13 : vector<1x128xf32>
    %c9 = arith.constant 9 : index
    %44 = memref.load %arg1[%c9] : memref<12xf32, #tpu.memory_space<smem>>
    %45 = vector.broadcast %44 : f32 to vector<1x128xf32>
    %46 = arith.mulf %45, %25 : vector<1x128xf32>
    %47 = arith.addf %43, %46 : vector<1x128xf32>
    %c11 = arith.constant 11 : index
    %48 = memref.load %arg1[%c11] : memref<12xf32, #tpu.memory_space<smem>>
    %49 = vector.broadcast %48 : f32 to vector<1x128xf32>
    %50 = arith.addf %47, %49 : vector<1x128xf32>
    %51 = arith.negf %50 : vector<1x128xf32>
    %52 = math.exp %51 : vector<1x128xf32>
    %cst_6 = arith.constant 1.000000e+00 : f32
    %53 = vector.broadcast %cst_6 : f32 to vector<1x128xf32>
    %54 = arith.addf %53, %52 : vector<1x128xf32>
    %55 = arith.divf %53, %54 : vector<1x128xf32>
    %56 = tpu.concatenate %40, %55 in 0 : vector<1x128xf32>, vector<1x128xf32> -> vector<2x128xf32>
    %c0_7 = arith.constant 0 : index
    %c0_8 = arith.constant 0 : index
    %57 = vector.load %arg3[%c0_7, %c0_8] : memref<2x128xf32, #tpu.memory_space<vmem>>, vector<2x128xf32>
    tpu.vector_store %arg3[%c0_7, %c0_8], %56 {strides = array<i32>} : memref<2x128xf32, #tpu.memory_space<vmem>>, vector<2x128xf32>,
    return
  }
  func.func @transform_0(%arg0: i32) -> i32 {
    %c0_i32 = arith.constant 0 : i32
    %c0_i32_0 = arith.constant 0 : i32
    return %c0_i32 : i32
  }
  func.func @transform_1(%arg0: i32) -> (i32, i32) {
    %c0_i32 = arith.constant 0 : i32
    %c0_i32_0 = arith.constant 0 : i32
    return %c0_i32, %arg0 : i32, i32
  }
  func.func @transform_2(%arg0: i32) -> (i32, i32) {
    %c0_i32 = arith.constant 0 : i32
    %c0_i32_0 = arith.constant 0 : i32
    return %c0_i32, %arg0 : i32, i32
  }
}

</mosaic_0001>

<bundles_post_ra>
// kernel: tpu_custom_call.1
= control target key start
LH: loop header
LB: loop body
LE: loop exit
PB: predicated region body
PF: predicated region fallthrough
CT: control target
= control target key end

     0   :  { %7 = vsyncpa [#allocation4], 0  ;;  %s206_s0 = inlined_call_operand.hbm [shape: f32[12], index: 0, kind: input, shape index: {}]   ;;  %s207_s1 = inlined_call_operand.vmem [shape: f32[2,128], index: 1, kind: input, shape index: {}]   ;;  %s208_s2 = inlined_call_operand.hbm [shape: f32[2,128], index: 2, kind: output, shape index: {}]  }
   0x1   :  { %8 = vsyncpa [#allocation3], 0  ;;  %s123_s11 = scalar_lea.hbm %s206_s0, 16 }
   0x2   :  { %p124_p0 = scmp.ne.s32.totalorder %s206_s0, %s123_s11  ;;  %p127_p1 = scmp.lt.u32.totalorder %s123_s11, %s206_s0 }
   0x4   :  { %p129_p2 = pnand %p127_p1, %p124_p0 }
   0x6   :  { %132 = shalt.err (!%p129_p2)
}
   0x7   :  { %s159_s16 = smov [#allocation2]  }
   0x8   :  { %16 = dma.hbm_to_smem %s206_s0, 16, %s159_s16, [#allocation4]  }
   0x9   :  { %155 = dma.done.wait [#allocation4], 16  }
   0xa   :  { %156 = vsyncadd [#allocation4], 4294967280 }
   0xb   :  { %22 = sfence }
   0xc   :  { %s25_s19 = sld [smem:[#allocation2]]  ;;  %s100_s20 = sld [smem:[#allocation2 + $0x2]]  ;;  %v23_v0 = vld [vmem:[%s207_s1] sm:$0x1]  ;;  %v24_v1 = vld [vmem:[%s207_s1 + $0x1] sm:$0x1] }
   0xd   :  { %s101_s21 = sld [smem:[#allocation2 + $0x4]]  ;;  %s102_s22 = sld [smem:[#allocation2 + $0x1]]  ;;  %vm82_vm0 = vcmask 1040384  }
   0xe   :  { %s103_s23 = sld [smem:[#allocation2 + $0x3]]  ;;  %s104_s24 = sld [smem:[#allocation2 + $0x5]] }
   0xf   :  { %s105_s29 = sld [smem:[#allocation2 + $0x6]]  ;;  %s109_s30 = sld [smem:[#allocation2 + $0x7]] }
  0x10   :  { %s106_s0 = sld [smem:[#allocation2 + $0x8]]  ;;  %s110_s3 = sld [smem:[#allocation2 + $0x9]] }
  0x11   :  { %s107_s4 = sld [smem:[#allocation2 + $0xa]]  ;;  %s111_s5 = sld [smem:[#allocation2 + $0xb]] }
  0x12   :  { %v26_v2 = vstv %s25_s19  ;;  %v29_v4 = vstv %s100_s20  ;;  %s160_s1 = smov [#allocation5]  }
  0x13   :  { %v27_v3 = vmul.f32 %v26_v2, %v23_v0  ;;  %v30_v5 = vmul.f32 %v29_v4, %v24_v1  ;;  %v37_v6 = vstv %s102_s22  ;;  %v33_v8 = vstv %s101_s21  ;;  %s91_s6 = sshll.u32 %s160_s1, 4  ;;  %s92_s6 = int_to_ptr.vmem [resolvable:$true] %s91_s6 }
  0x14   :  { %v40_v7 = vstv %s103_s23  ;;  %v38_v9 = vmul.f32 %v37_v6, %v23_v0  ;;  %v44_v12 = vstv %s104_s24  ;;  %s133_s7 = scalar_lea.vmem %s92_s6, 32  ;;  %p138_p4 = scmp.lt.s32.totalorder %s92_s6, %s92_s6 }
  0x15   :  { %v41_v10 = vmul.f32 %v40_v7, %v24_v1  ;;  %v31_v11 = vadd.f32 %v30_v5, %v27_v3  ;;  %v48_v16 = vstv %s105_s29  ;;  %v64_v17 = vstv %s109_s30  ;;  %p134_p3 = scmp.ne.s32.totalorder %s92_s6, %s133_s7  ;;  %p139_p5 = scmp.lt.s32.totalorder %s133_s7, %s133_s7 }
  0x16   :  { %v51_v19 = vstv %s106_s0  ;;  %v67_v20 = vstv %s110_s3 }
  0x17   :  { %v42_v13 = vadd.f32 %v41_v10, %v38_v9  ;;  %v34_v14 = vadd.f32 %v33_v8, %v31_v11  ;;  %v55_v26 = vstv %s107_s4  ;;  %v71_v27 = vstv %s111_s5  ;;  %p140_p6 = por %p139_p5, %p138_p4 }
  0x19   :  { %v45_v15 = vadd.f32 %v44_v12, %v42_v13  ;;  %v35_v18 = vmax.f32 %v34_v14, 0.0  ;;  %p141_p7 = pnand %p140_p6, %p134_p3 }
  0x1b   :  { %v46_v21 = vmax.f32 %v45_v15, 0.0  ;;  %v49_v22 = vmul.f32 %v48_v16, %v35_v18  ;;  %v65_v23 = vmul.f32 %v64_v17, %v35_v18 }
  0x1d   :  { %v52_v24 = vmul.f32 %v51_v19, %v46_v21  ;;  %v68_v25 = vmul.f32 %v67_v20, %v46_v21 }
  0x1f   :  { %v53_v28 = vadd.f32 %v52_v24, %v49_v22  ;;  %v69_v29 = vadd.f32 %v68_v25, %v65_v23 }
  0x21   :  { %v56_v30 = vadd.f32 %v55_v26, %v53_v28  ;;  %v72_v31 = vadd.f32 %v71_v27, %v69_v29 }
  0x23   :  { %v108_v32 = vmul.f32 -1.442695, %v56_v30  ;;  %v112_v33 = vmul.f32 -1.442695, %v72_v31 }
  0x25   :  { %115 = vpow2.f32 %v108_v32 }
  0x26   :  { %117 = vpow2.f32 %v112_v33 }
  0x2f   :  { %v116_v34 = vpop.eup %115 }
  0x30   :  { %v118_v35 = vpop.eup %117  ;;  %v60_v36 = vadd.f32 1.0, %v116_v34 }
  0x31   :  { %v76_v37 = vadd.f32 1.0, %v118_v35 }
  0x32   :  { %119 = vrcp.f32 %v60_v36 }
  0x33   :  { %121 = vrcp.f32 %v76_v37 }
  0x3c   :  { %v120_v38 = vpop.eup %119 }
  0x3d   :  { %v122_v39 = vpop.eup %121 }
  0x3e   :  { %v80_v40 = vrot.slane %v122_v39, 7 }
  0x40   :  { %v83_v41 = vsel %vm82_vm0, %v120_v38, %v80_v40 }
  0x41   :  { %84 = vst [vmem:[#allocation5] sm:$0x3] %v83_v41 }
  0x42   :  { %144 = shalt.err (!%p141_p7)
}
  0x43   :  { %s145_s10 = scalar_lea.hbm %s208_s2, 32 }
  0x44   :  { %p146_p8 = scmp.ne.s32.totalorder %s208_s2, %s145_s10  ;;  %p149_p9 = scmp.lt.u32.totalorder %s145_s10, %s208_s2 }
  0x46   :  { %p151_p10 = pnand %p149_p9, %p146_p8 }
  0x48   :  { %154 = shalt.err (!%p151_p10)
}
  0x49   :  { %94 = dma.vmem_to_hbm [thread:$0]  %s92_s6, 32, %s208_s2, [#allocation3]  }
  0x4a   :  { %157 = dma.done.wait [#allocation3], 32  }
  0x4b   :  { %158 = vsyncadd [#allocation3], 4294967264 }
  0x4c   :  { %98 = vsyncpa [#allocation3], 1 }
  0x4d   :  { %99 = vsyncpa [#allocation4], 1 }

</bundles_post_ra>
